<compile_context>
chip_gen: v7x
topology: tpu7x:2x2x1
jax: 0.10.0
libtpu: 0.0.40
codegen_flags: <defaults>
</compile_context>

<pallas_src>
import functools

import jax
import jax.numpy as jnp
from jax.experimental import pallas as pl
from jax.experimental.pallas import tpu as pltpu


def _round_up(x, m):
    return ((x + m - 1) // m) * m


# Per-generation default batch-tile (lanes per grid step).
_TILE_N_BY_GEN = {5: 65536, 6: 131072, 7: 262144}


def _tpu_generation():
    """Best-effort TPU generation from device_kind; conservative fallback."""
    try:
        kind = jax.devices()[0].device_kind.lower()
    except Exception:
        return 5
    if "7" in kind:
        return 7
    if "v6" in kind:
        return 6
    if "v5" in kind:
        return 5
    return 5  # v2-v4 / unknown: conservative tile & single-core split


def _dmi_mat_kernel(n_total, logits_ref, target_ref, mat_ref, acc_ref):
    """One batch tile of mat[k, j] += sum_n [target_n == k] * softmax(x_n)[j].

    logits_ref: [C, TILE_N]  (class on sublanes, batch on lanes)
    target_ref: [1, TILE_N]  int32 labels
    mat_ref:    [C, C]       output block for this core-split
    acc_ref:    [C, C]       f32 VMEM accumulator, persists across grid steps
    """
    split = pl.program_id(0)
    step = pl.program_id(1)

    @pl.when(step == 0)
    def _():
        acc_ref[...] = jnp.zeros_like(acc_ref)

    c, tn = logits_ref.shape

    # In-kernel ragged-tail masking (replaces wrapper-side HBM pad copies).
    col0 = (split * pl.num_programs(1) + step) * tn
    valid = n_total - col0
    lane_ids = jax.lax.broadcasted_iota(jnp.int32, (c, tn), dimension=1)
    mask = lane_ids < valid                                    # [C, TN]

    # Zero out-of-bounds columns so stale VMEM (possibly NaN) never reaches
    # the exp/max path; masked columns get probs == 1/C and a zero one-hot.
    x = jnp.where(mask, logits_ref[...].astype(jnp.float32), 0.0)   # [C, TN]

    # Softmax over the class (sublane) axis -- lane-dense exp on the EUP.
    m = jnp.max(x, axis=0, keepdims=True)                      # [1, TN]
    e = jnp.exp(x - m)                                         # [C, TN]
    denom = jnp.sum(e, axis=0, keepdims=True)                  # [1, TN]
    # EUP approximate reciprocal + one Newton step: ~1e-7 relative error.
    r = pl.reciprocal(denom, approx=True)
    r = r * (2.0 - denom * r)
    probs = e * r                                              # [C, TN]

    # One-hot generated already transposed: onehot[k, n] = (target[n] == k),
    # ANDed with the validity mask so OOB lanes (and garbage labels in the
    # stale region) contribute nothing.
    class_ids = jax.lax.broadcasted_iota(jnp.int32, (c, tn), dimension=0)
    onehot = ((class_ids == target_ref[...]) & mask).astype(jnp.float32)

    # mat[k, j] += sum_n onehot[k, n] * probs[j, n]  (contract over batch).
    # TODO(synk): the MXU uses only C of its rows here; if profiling ever puts
    # vmatmul on the critical path, switch to C masked lane reductions (VPU/XLU).
    acc_ref[...] += jax.lax.dot_general(
        onehot, probs,
        dimension_numbers=(((1,), (1,)), ((), ())),
        preferred_element_type=jnp.float32,
    )

    @pl.when(step == pl.num_programs(1) - 1)
    def _():
        mat_ref[...] = acc_ref[...]


def dmi_confusion_matrix(output, target, num_classes, *, tile_n=None):
    """mat = one_hot(target).T @ softmax(output, axis=1), computed on-TPU."""
    n, c = output.shape
    assert c == num_classes, (c, num_classes)

    gen = _tpu_generation()
    if tile_n is None:
        tile_n = _TILE_N_BY_GEN.get(gen, 65536)

    # Layout plumbing: class on sublanes, batch on lanes. The transpose is the
    # only pre-kernel HBM op left; allow_input_fusion below lets XLA fold it
    # (and the free target reshape) into the pallas_call inputs.
    logits_t = jnp.transpose(output)                           # [C, N]
    target_row = target.astype(jnp.int32).reshape(1, n)        # [1, N]

    n_ceil = _round_up(max(n, 1), 128)
    tile = min(_round_up(tile_n, 128), n_ceil)
    n_tiles = pl.cdiv(n_ceil, tile)

    # Dual-TensorCore split: only on v7x (2 TCs) and only when it divides the
    # tile count evenly (never issue a fully out-of-bounds block DMA).
    num_splits = 2 if (gen >= 7 and n_tiles >= 2 and n_tiles % 2 == 0) else 1
    tiles_per_split = n_tiles // num_splits
    if num_splits == 2:
        dim_sems = (pltpu.CORE_PARALLEL, pltpu.ARBITRARY)
    else:
        dim_sems = (pltpu.PARALLEL, pltpu.ARBITRARY)

    # VMEM footprint of one pipeline stage (logits + targets, double buffered;
    # sublane dims pad to 8, so the int32 target row costs 8*tile words).
    c_pad = _round_up(c, 8)
    step_bytes = 2 * (c_pad * tile * 4 + 8 * tile * 4)
    vmem_limit = min(max(32 << 20, int(1.5 * step_bytes)), 56 << 20)

    cost = pl.CostEstimate(
        flops=2 * n * c * c + 8 * n * c,
        transcendentals=n * c,
        bytes_accessed=(n * c * output.dtype.itemsize + n * 4
                        + num_splits * c * c * 4),
    )

    partial = pl.pallas_call(
        functools.partial(_dmi_mat_kernel, n),
        out_shape=jax.ShapeDtypeStruct((num_splits, c, c), jnp.float32),
        grid_spec=pltpu.PrefetchScalarGridSpec(
            num_scalar_prefetch=0,
            grid=(num_splits, tiles_per_split),
            in_specs=[
                pl.BlockSpec((c, tile),
                             lambda s, i: (0, s * tiles_per_split + i)),
                pl.BlockSpec((1, tile),
                             lambda s, i: (0, s * tiles_per_split + i)),
            ],
            out_specs=pl.BlockSpec((None, c, c), lambda s, i: (s, 0, 0)),
            scratch_shapes=[pltpu.VMEM((c, c), jnp.float32)],
        ),
        compiler_params=pltpu.CompilerParams(
            dimension_semantics=dim_sems,
            allow_input_fusion=[True, True],
            vmem_limit_bytes=vmem_limit,
        ),
        cost_estimate=cost,
    )(logits_t, target_row)

    return jnp.sum(partial, axis=0)                            # [C, C]


def dmi_loss(output, target, num_classes, *, tile_n=None):
    """output: [N, num_classes] float logits; target: [N] int labels."""
    mat = dmi_confusion_matrix(output, target, num_classes, tile_n=tile_n)
    # TODO(synk): the tiny CxC determinant (LU with pivoting) stays in plain
    # JAX; -log(|det| + 1e-3) is evaluated as -logaddexp(log|det|, log 1e-3)
    # so it cannot overflow f32 at large N (same mathematical value).
    _, logabsdet = jnp.linalg.slogdet(mat.astype(jnp.float32))
    return -jnp.logaddexp(logabsdet, jnp.log(jnp.float32(0.001)))


def dmi_loss_ref(output, target, num_classes):
    """Pure-JAX reference mirroring the PyTorch forward."""
    probs = jax.nn.softmax(output.astype(jnp.float32), axis=1)
    onehot = jax.nn.one_hot(target, num_classes, dtype=jnp.float32)
    mat = onehot.T @ probs
    return -1.0 * jnp.log(jnp.abs(jnp.linalg.det(mat)) + 0.001)


if __name__ == "__main__":
    NUM_CLASSES = 8
    BATCH = 500     # not a multiple of 128 -> exercises the in-kernel masking

    key = jax.random.PRNGKey(0)
    k_logits, k_target = jax.random.split(key)
    output = jax.random.normal(k_logits, (BATCH, NUM_CLASSES), dtype=jnp.float32)
    target = jax.random.randint(k_target, (BATCH,), 0, NUM_CLASSES,
                                dtype=jnp.int32)

    # Per-generation default tiling (batch fits a single lane-tile here).
    loss = dmi_loss(output, target, NUM_CLASSES)
    loss = jax.block_until_ready(loss)

    # References.
    probs_ref = jax.nn.softmax(output, axis=1)
    mat_ref = jax.nn.one_hot(target, NUM_CLASSES, dtype=jnp.float32).T @ probs_ref
    loss_ref = dmi_loss_ref(output, target, NUM_CLASSES)

    # Default tiling and a deliberately small tile (multi-step accumulation +
    # ragged final tile) must both reproduce the confusion matrix.
    mat_default = dmi_confusion_matrix(output, target, NUM_CLASSES)
    mat_small = dmi_confusion_matrix(output, target, NUM_CLASSES, tile_n=256)

    assert jnp.allclose(mat_default, mat_ref, rtol=1e-4, atol=1e-3), (
        mat_default, mat_ref)
    assert jnp.allclose(mat_small, mat_ref, rtol=1e-4, atol=1e-3), (
        mat_small, mat_ref)
    assert jnp.allclose(loss, loss_ref, rtol=1e-3, atol=1e-3), (loss, loss_ref)

    print("KERNEL_OK")
</pallas_src>

<mosaic_0001>
module attributes {stable_mosaic.version = 11 : i64} {
  func.func @_dmi_mat_kernel(%arg0: i32, %arg1: i32, %arg2: memref<8x512xf32, #tpu.memory_space<vmem>>, %arg3: memref<1x512xi32, #tpu.memory_space<vmem>>, %arg4: memref<1x8x8xf32, #tpu.memory_space<vmem>>, %arg5: memref<8x8xf32, #tpu.memory_space<vmem>>) attributes {dimension_semantics = [#tpu.dimension_semantics<parallel>, #tpu.dimension_semantics<arbitrary>], iteration_bounds = array<i64: 1, 1>, scalar_prefetch = 0 : i64, scratch_operands = 1 : i64, tpu.core_type = #tpu.core_type<tc>, window_params = [{transform_indices = @transform_0, window_bounds = array<i64: 8, 512>}, {transform_indices = @transform_1, window_bounds = array<i64: 1, 512>}, {transform_indices = @transform_2, window_bounds = array<i64: 1, 8, 8>}]} {
    %c0_i32 = arith.constant 0 : i32
    %0 = arith.cmpi eq, %arg1, %c0_i32 : i32
    %1 = arith.extui %0 : i1 to i32
    %c0_i32_0 = arith.constant 0 : i32
    %2 = arith.cmpi ne, %1, %c0_i32_0 : i32
    scf.if %2 {
      %cst_14 = arith.constant 0.000000e+00 : f32
      %41 = vector.broadcast %cst_14 : f32 to vector<8x8xf32>
      %c0_15 = arith.constant 0 : index
      %c0_16 = arith.constant 0 : index
      %42 = vector.load %arg5[%c0_15, %c0_16] : memref<8x8xf32, #tpu.memory_space<vmem>>, vector<8x8xf32>
      tpu.vector_store %arg5[%c0_15, %c0_16], %41 {strides = array<i32>} : memref<8x8xf32, #tpu.memory_space<vmem>>, vector<8x8xf32>,
    } else {
    }
    %c1_i32 = arith.constant 1 : i32
    %3 = arith.muli %arg0, %c1_i32 : i32
    %4 = arith.addi %3, %arg1 : i32
    %c512_i32 = arith.constant 512 : i32
    %5 = arith.muli %4, %c512_i32 : i32
    %c500_i32 = arith.constant 500 : i32
    %6 = arith.subi %c500_i32, %5 : i32
    %7 = tpu.iota {dimensions = array<i32: 1>} : vector<8x512xi32>
    %8 = vector.broadcast %6 : i32 to vector<8x512xi32>
    %9 = arith.cmpi slt, %7, %8 : vector<8x512xi32>
    %c0 = arith.constant 0 : index
    %c0_1 = arith.constant 0 : index
    %10 = vector.load %arg2[%c0, %c0_1] : memref<8x512xf32, #tpu.memory_space<vmem>>, vector<8x512xf32>
    %cst = arith.constant 0.000000e+00 : f32
    %11 = vector.broadcast %cst : f32 to vector<8x512xf32>
    %12 = arith.select %9, %10, %11 : vector<8x512xi1>, vector<8x512xf32>
    %cst_2 = arith.constant dense<0xFF800000> : vector<512xf32>
    %13 = vector.multi_reduction <maximumf>, %12, %cst_2 [0] : vector<8x512xf32> to vector<512xf32>
    %14 = vector.shape_cast %13 : vector<512xf32> to vector<1x512xf32>
    %15 = vector.broadcast %14 : vector<1x512xf32> to vector<8x512xf32>
    %16 = arith.subf %12, %15 : vector<8x512xf32>
    %17 = math.exp %16 : vector<8x512xf32>
    %cst_3 = arith.constant dense<0.000000e+00> : vector<512xf32>
    %18 = vector.multi_reduction <add>, %17, %cst_3 [0] : vector<8x512xf32> to vector<512xf32>
    %19 = vector.shape_cast %18 : vector<512xf32> to vector<1x512xf32>
    %20 = tpu.reciprocal %19 {approx = true} : vector<1x512xf32> -> vector<1x512xf32>
    %21 = arith.mulf %19, %20 : vector<1x512xf32>
    %cst_4 = arith.constant 2.000000e+00 : f32
    %22 = vector.broadcast %cst_4 : f32 to vector<1x512xf32>
    %23 = arith.subf %22, %21 : vector<1x512xf32>
    %24 = arith.mulf %20, %23 : vector<1x512xf32>
    %25 = vector.broadcast %24 : vector<1x512xf32> to vector<8x512xf32>
    %26 = arith.mulf %17, %25 : vector<8x512xf32>
    %27 = tpu.iota {dimensions = array<i32: 0>} : vector<8x512xi32>
    %c0_5 = arith.constant 0 : index
    %c0_6 = arith.constant 0 : index
    %28 = vector.load %arg3[%c0_5, %c0_6] : memref<1x512xi32, #tpu.memory_space<vmem>>, vector<1x512xi32>
    %29 = vector.broadcast %28 : vector<1x512xi32> to vector<8x512xi32>
    %30 = arith.cmpi eq, %27, %29 : vector<8x512xi32>
    %31 = arith.andi %30, %9 : vector<8x512xi1>
    %32 = arith.extui %31 : vector<8x512xi1> to vector<8x512xi32>
    %33 = arith.sitofp %32 : vector<8x512xi32> to vector<8x512xf32>
    %c0_7 = arith.constant 0 : index
    %c0_8 = arith.constant 0 : index
    %34 = vector.load %arg5[%c0_7, %c0_8] : memref<8x8xf32, #tpu.memory_space<vmem>>, vector<8x8xf32>
    %cst_9 = arith.constant dense<0.000000e+00> : vector<8x8xf32>
    %35 = tpu.matmul %33, %26, %cst_9 {dimension_numbers = #tpu.dot_dimension_numbers<[1], [1], [0], [0], [0, 0, 1, 0], [], []>} : vector<8x512xf32>, vector<8x512xf32>, vector<8x8xf32> -> vector<8x8xf32>
    %36 = arith.addf %34, %35 : vector<8x8xf32>
    %c0_10 = arith.constant 0 : index
    %c0_11 = arith.constant 0 : index
    %37 = vector.load %arg5[%c0_10, %c0_11] : memref<8x8xf32, #tpu.memory_space<vmem>>, vector<8x8xf32>
    tpu.vector_store %arg5[%c0_10, %c0_11], %36 {strides = array<i32>} : memref<8x8xf32, #tpu.memory_space<vmem>>, vector<8x8xf32>,
    %c0_i32_12 = arith.constant 0 : i32
    %38 = arith.cmpi eq, %arg1, %c0_i32_12 : i32
    %39 = arith.extui %38 : i1 to i32
    %c0_i32_13 = arith.constant 0 : i32
    %40 = arith.cmpi ne, %39, %c0_i32_13 : i32
    scf.if %40 {
      %c0_14 = arith.constant 0 : index
      %c0_15 = arith.constant 0 : index
      %41 = vector.load %arg5[%c0_14, %c0_15] : memref<8x8xf32, #tpu.memory_space<vmem>>, vector<8x8xf32>
      %c0_16 = arith.constant 0 : index
      %c0_17 = arith.constant 0 : index
      %c0_18 = arith.constant 0 : index
      %42 = vector.load %arg4[%c0_16, %c0_17, %c0_18] : memref<1x8x8xf32, #tpu.memory_space<vmem>>, vector<1x8x8xf32>
      %43 = vector.shape_cast %42 : vector<1x8x8xf32> to vector<8x8xf32>
      %44 = vector.shape_cast %41 : vector<8x8xf32> to vector<1x8x8xf32>
      tpu.vector_store %arg4[%c0_16, %c0_17, %c0_18], %44 {strides = array<i32>} : memref<1x8x8xf32, #tpu.memory_space<vmem>>, vector<1x8x8xf32>,
    } else {
    }
    return
  }
  func.func @transform_0(%arg0: i32, %arg1: i32) -> (i32, i32) {
    %c1_i32 = arith.constant 1 : i32
    %0 = arith.muli %arg0, %c1_i32 : i32
    %1 = arith.addi %0, %arg1 : i32
    %c0_i32 = arith.constant 0 : i32
    %c0_i32_0 = arith.constant 0 : i32
    return %c0_i32, %1 : i32, i32
  }
  func.func @transform_1(%arg0: i32, %arg1: i32) -> (i32, i32) {
    %c1_i32 = arith.constant 1 : i32
    %0 = arith.muli %arg0, %c1_i32 : i32
    %1 = arith.addi %0, %arg1 : i32
    %c0_i32 = arith.constant 0 : i32
    %c0_i32_0 = arith.constant 0 : i32
    return %c0_i32, %1 : i32, i32
  }
  func.func @transform_2(%arg0: i32, %arg1: i32) -> (i32, i32, i32) {
    %c0_i32 = arith.constant 0 : i32
    %c0_i32_0 = arith.constant 0 : i32
    %c0_i32_1 = arith.constant 0 : i32
    return %arg0, %c0_i32, %c0_i32_0 : i32, i32, i32
  }
}

</mosaic_0001>

<bundles_post_ra>
// kernel: tpu_custom_call.1
= control target key start
LH: loop header
LB: loop body
LE: loop exit
PB: predicated region body
PF: predicated region fallthrough
CT: control target
= control target key end

     0   :  { %7 = vsyncpa [#allocation4], 0  ;;  %s534_s0 = inlined_call_operand.hbm [shape: f32[8,500], index: 0, kind: input, shape index: {}]   ;;  %s535_s1 = inlined_call_operand.hbm [shape: s32[1,500], index: 1, kind: input, shape index: {}]   ;;  %s536_s2 = inlined_call_operand.hbm [shape: f32[1,8,8], index: 2, kind: output, shape index: {}]  }
   0x1   :  { %8 = vsyncpa [#allocation7], 0 }
   0x2   :  { %9 = vsyncpa [#allocation5], 0  ;;  %s456_s9 = smov [#allocation3]   ;;  %s457_s11 = smov [#allocation6]  }
   0x3   :  { %s20_s10 = sshll.u32 %s456_s9, 4  ;;  %s34_s12 = sshll.u32 %s457_s11, 4  ;;  %s21_s10 = int_to_ptr.vmem [resolvable:$true] %s20_s10  ;;  %s35_s12 = int_to_ptr.vmem [resolvable:$true] %s34_s12 }
   0x4   :  { %s384_s15 = scalar_lea.hbm %s534_s0, 512 }
   0x5   :  { %p385_p0 = scmp.ne.s32.totalorder %s534_s0, %s384_s15  ;;  %p388_p1 = scmp.lt.u32.totalorder %s384_s15, %s534_s0 }
   0x7   :  { %p390_p2 = pnand %p388_p1, %p385_p0 }
   0x9   :  { %393 = shalt.err (!%p390_p2)
}
   0xa   :  { %s394_s20 = scalar_lea.vmem %s21_s10, 512  ;;  %p399_p4 = scmp.lt.s32.totalorder %s21_s10, %s21_s10 }
   0xb   :  { %p395_p3 = scmp.ne.s32.totalorder %s21_s10, %s394_s20  ;;  %p400_p5 = scmp.lt.s32.totalorder %s394_s20, %s394_s20 }
   0xd   :  { %p401_p6 = por %p400_p5, %p399_p4 }
   0xf   :  { %p402_p7 = pnand %p401_p6, %p395_p3 }
  0x11   :  { %405 = shalt.err (!%p402_p7)
}
  0x12   :  { %23 = dma.hbm_to_vmem [thread:$0]  %s534_s0, 512, %s21_s10, [#allocation4]  }
  0x13   :  { %s406_s25 = scalar_lea.hbm %s535_s1, 64 }
  0x14   :  { %p407_p8 = scmp.ne.s32.totalorder %s535_s1, %s406_s25  ;;  %p410_p9 = scmp.lt.u32.totalorder %s406_s25, %s535_s1 }
  0x16   :  { %p412_p10 = pnand %p410_p9, %p407_p8 }
  0x18   :  { %415 = shalt.err (!%p412_p10)
}
  0x19   :  { %s416_s30 = scalar_lea.vmem %s35_s12, 64  ;;  %p421_p12 = scmp.lt.s32.totalorder %s35_s12, %s35_s12 }
  0x1a   :  { %p417_p11 = scmp.ne.s32.totalorder %s35_s12, %s416_s30  ;;  %p422_p13 = scmp.lt.s32.totalorder %s416_s30, %s416_s30 }
  0x1c   :  { %p423_p0 = por %p422_p13, %p421_p12 }
  0x1e   :  { %p424_p1 = pnand %p423_p0, %p417_p11 }
  0x20   :  { %427 = shalt.err (!%p424_p1)
}
  0x21   :  { %37 = dma.hbm_to_vmem [thread:$0]  %s535_s1, 64, %s35_s12, [#allocation7]  }
  0x22   :  { %450 = dma.done.wait [#allocation4], 512  }
  0x23   :  { %451 = vsyncadd [#allocation4], 4294966784 }
  0x24   :  { %452 = dma.done.wait [#allocation7], 64  }
  0x25   :  { %453 = vsyncadd [#allocation7], 4294967232  ;;  %v57_v0 = vlaneseq  ;;  %v68_v6 = vld [vmem:[#allocation3 + $0x8] sm:$0xff]  ;;  %v67_v7 = vld [vmem:[#allocation3] sm:$0xff]  ;;  %v458_v24 = vmov 1.0   ;;  %vm52_vm6 = vcmask 64512  }
  0x26   :  { %v70_v8 = vld [vmem:[#allocation3 + $0x18] sm:$0xff]  ;;  %v81_v9 = vrot.slane %v68_v6, 4  ;;  %v75_v10 = vrot.slane %v67_v7, 4  ;;  %v69_v12 = vld [vmem:[#allocation3 + $0x10] sm:$0xff]  ;;  %v505_v13 = vld [vmem:[#allocation6] sm:$0xf] }
  0x27   :  { %v58_v1 = vand.u32 127, %v57_v0  ;;  %v500_v2 = vshrl.u32 %v57_v0, 7  ;;  %v87_v15 = vrot.slane %v69_v12, 4  ;;  %s460_s1 = smov [#allocation8]  }
  0x28   :  { %v82_v17 = vmax.f32 %v68_v6, %v81_v9  ;;  %v76_v18 = vmax.f32 %v67_v7, %v75_v10  ;;  %s345_s4 = sshll.u32 %s460_s1, 4  ;;  %s346_s4 = int_to_ptr.vmem [resolvable:$true] %s345_s4 }
  0x29   :  { %v61_v3 = vadd.s32 384, %v58_v1  ;;  %v164_v4 = vsub.s32 1, %v500_v2  ;;  %v172_v5 = vsub.s32 3, %v500_v2  ;;  %v88_v21 = vmax.f32 %v69_v12, %v87_v15  ;;  %s428_s5 = scalar_lea.vmem %s346_s4, 128  ;;  %p433_p3 = scmp.lt.s32.totalorder %s346_s4, %s346_s4 }
  0x2a   :  { %v83_v22 = vrot.slane %v82_v17, 2  ;;  %v77_v23 = vrot.slane %v76_v18, 2  ;;  %p429_p2 = scmp.ne.s32.totalorder %s346_s4, %s428_s5  ;;  %p434_p4 = scmp.lt.s32.totalorder %s428_s5, %s428_s5 }
  0x2b   :  { %vm66_vm0 = vcmp.lt.s32.totalorder %v61_v3, 500  ;;  %v165_v16 = vrot.slane %v505_v13, %v164_v4  ;;  %v173_v19 = vrot.slane %v505_v13, %v172_v5  ;;  %v89_v26 = vrot.slane %v88_v21, 2 }
  0x2c   :  { %v74_v11 = vsel %vm66_vm0, %v70_v8, 0.0  ;;  %v84_v27 = vmax.f32 %v82_v17, %v83_v22  ;;  %v78_v28 = vmax.f32 %v76_v18, %v77_v23  ;;  %v160_v18 = vsub.s32 0, %v500_v2  ;;  %p435_p5 = por %p434_p4, %p433_p3 }
  0x2d   :  { %v93_v14 = vrot.slane %v74_v11, 4  ;;  %vm175_vm1 = vcmp.eq.s32.totalorder %v500_v2, %v165_v16  ;;  %vm177_vm2 = vcmp.eq.s32.totalorder %v500_v2, %v173_v19  ;;  %v90_v30 = vmax.f32 %v88_v21, %v89_v26 }
  0x2e   :  { %359 = vmatprep.mubr.msk.f32.mxu0 %vm175_vm1, %v458_v24  ;;  %vm181_vm3 = vmand %vm177_vm2, %vm66_vm0  ;;  %v85_v31 = vrot.slane %v84_v27, 1  ;;  %v79_v32 = vrot.slane %v78_v28, 1  ;;  %p436_p6 = pnand %p435_p5, %p429_p2 }
  0x2f   :  { %v94_v20 = vmax.f32 %v74_v11, %v93_v14  ;;  %361 = vmatprep.mubr.msk.f32.mxu1 %vm181_vm3, %v458_v24  ;;  %v91_v34 = vrot.slane %v90_v30, 1 }
  0x30   :  { %v86_v35 = vmax.f32 %v84_v27, %v85_v31  ;;  %v80_v36 = vmax.f32 %v78_v28, %v79_v32 }
  0x31   :  { %v95_v25 = vrot.slane %v94_v20, 2  ;;  %v92_v38 = vmax.f32 %v90_v30, %v91_v34  ;;  %v161_v30 = vrot.slane %v505_v13, %v160_v18 }
  0x32   :  { %v100_v39 = vsub.f32 %v68_v6, %v86_v35  ;;  %v99_v40 = vsub.f32 %v67_v7, %v80_v36 }
  0x33   :  { %v96_v29 = vmax.f32 %v94_v20, %v95_v25  ;;  %v101_v42 = vsub.f32 %v69_v12, %v92_v38  ;;  %v168_v25 = vsub.s32 2, %v500_v2  ;;  %vm174_vm4 = vcmp.eq.s32.totalorder %v500_v2, %v161_v30 }
  0x34   :  { %v105_v43 = vmul.f32 1.442695, %v100_v39  ;;  %v103_v44 = vmul.f32 1.442695, %v99_v40  ;;  %v459_v38 = vmov 0.0  }
  0x35   :  { %v97_v33 = vrot.slane %v96_v29, 1  ;;  %v107_v46 = vmul.f32 1.442695, %v101_v42  ;;  %v169_v35 = vrot.slane %v505_v13, %v168_v25  ;;  %53 = vst.msk [vmem:[#allocation2] sm:$0xff] %vm52_vm6, %v459_v38 }
  0x36   :  { %368 = vpow2.f32 %v105_v43 }
  0x37   :  { %v98_v37 = vmax.f32 %v96_v29, %v97_v33  ;;  %370 = vpow2.f32 %v103_v44  ;;  %vm176_vm5 = vcmp.eq.s32.totalorder %v500_v2, %v169_v35 }
  0x39   :  { %v102_v41 = vsub.f32 %v74_v11, %v98_v37 }
  0x3b   :  { %v109_v45 = vmul.f32 1.442695, %v102_v41 }
  0x3c   :  { %v190_v13 = vld [vmem:[#allocation2] sm:$0xff] }
  0x3d   :  { %372 = vpow2.f32 %v109_v45 }
  0x3e   :  { %374 = vpow2.f32 %v107_v46 }
  0x40   :  { %v369_v47 = vpop.eup %368 }
  0x41   :  { %v371_v48 = vpop.eup %370  ;;  %v117_v49 = vrot.slane %v369_v47, 4 }
  0x42   :  { %v111_v51 = vrot.slane %v371_v48, 4 }
  0x43   :  { %v118_v53 = vadd.f32 %v369_v47, %v117_v49 }
  0x44   :  { %v112_v55 = vadd.f32 %v371_v48, %v111_v51 }
  0x45   :  { %v119_v57 = vrot.slane %v118_v53, 2 }
  0x46   :  { %v113_v59 = vrot.slane %v112_v55, 2 }
  0x47   :  { %v373_v50 = vpop.eup %372  ;;  %v120_v61 = vadd.f32 %v119_v57, %v118_v53 }
  0x48   :  { %v375_v52 = vpop.eup %374  ;;  %v129_v54 = vrot.slane %v373_v50, 4  ;;  %v114_v63 = vadd.f32 %v113_v59, %v112_v55 }
  0x49   :  { %v123_v56 = vrot.slane %v375_v52, 4  ;;  %v121_v1 = vrot.slane %v120_v61, 1 }
  0x4a   :  { %v130_v58 = vadd.f32 %v373_v50, %v129_v54  ;;  %v115_v4 = vrot.slane %v114_v63, 1 }
  0x4b   :  { %v124_v60 = vadd.f32 %v375_v52, %v123_v56  ;;  %v122_v6 = vadd.f32 %v121_v1, %v120_v61 }
  0x4c   :  { %v131_v62 = vrot.slane %v130_v58, 2  ;;  %v116_v8 = vadd.f32 %v115_v4, %v114_v63 }
  0x4d   :  { %v125_v0 = vrot.slane %v124_v60, 2  ;;  %376 = vrcp.f32 %v122_v6 }
  0x4e   :  { %v132_v3 = vadd.f32 %v131_v62, %v130_v58  ;;  %378 = vrcp.f32 %v116_v8 }
  0x4f   :  { %v126_v5 = vadd.f32 %v125_v0, %v124_v60 }
  0x50   :  { %v133_v7 = vrot.slane %v132_v3, 1 }
  0x51   :  { %v127_v9 = vrot.slane %v126_v5, 1 }
  0x52   :  { %v134_v10 = vadd.f32 %v133_v7, %v132_v3 }
  0x53   :  { %v128_v11 = vadd.f32 %v127_v9, %v126_v5 }
  0x54   :  { %380 = vrcp.f32 %v134_v10 }
  0x55   :  { %382 = vrcp.f32 %v128_v11 }
  0x57   :  { %v377_v12 = vpop.eup %376 }
  0x58   :  { %v379_v14 = vpop.eup %378  ;;  %v140_v15 = vmul.f32 %v377_v12, %v122_v6 }
  0x59   :  { %v139_v17 = vmul.f32 %v379_v14, %v116_v8 }
  0x5a   :  { %v144_v20 = vsub.f32 2.0, %v140_v15 }
  0x5b   :  { %v143_v22 = vsub.f32 2.0, %v139_v17 }
  0x5c   :  { %v148_v26 = vmul.f32 %v377_v12, %v144_v20 }
  0x5d   :  { %v147_v28 = vmul.f32 %v379_v14, %v143_v22 }
  0x5e   :  { %v381_v16 = vpop.eup %380  ;;  %v152_v31 = vmul.f32 %v369_v47, %v148_v26 }
  0x5f   :  { %v383_v19 = vpop.eup %382  ;;  %v142_v21 = vmul.f32 %v381_v16, %v134_v10  ;;  %v151_v33 = vmul.f32 %v371_v48, %v147_v28 }
  0x60   :  { %v141_v23 = vmul.f32 %v383_v19, %v128_v11  ;;  %191 = vmatprep.subr.mxu0 %v152_v31 }
  0x61   :  { %v146_v27 = vsub.f32 2.0, %v142_v21  ;;  %192 = vmatpush1.xpose.msra.mxu0 %v151_v33 }
  0x62   :  { %v145_v29 = vsub.f32 2.0, %v141_v23 }
  0x63   :  { %v150_v32 = vmul.f32 %v381_v16, %v146_v27 }
  0x64   :  { %v149_v34 = vmul.f32 %v383_v19, %v145_v29  ;;  %360 = vmatmul.mubr.msk.f32.vlgmr.msra.gmra.mrb[0].mxu0 %vm174_vm4, %v458_v24 }
  0x65   :  { %v154_v36 = vmul.f32 %v373_v50, %v150_v32 }
  0x66   :  { %v153_v37 = vmul.f32 %v375_v52, %v149_v34 }
  0x67   :  { %261 = vmatprep.subr.mxu1 %v154_v36 }
  0x68   :  { %262 = vmatpush1.xpose.msra.mxu1 %v153_v37 }
  0x6b   :  { %362 = vmatmul.mubr.msk.f32.vlgmr.msra.gmra.mrb[0].mxu1 %vm176_vm5, %v458_v24 }
 0x137   :  { %v257_v39 = vpop.f32.mrb[0].mxu0 }
 0x138   :  { %v259_v40 = vpop.f32.mrb[1].mxu0 }
 0x13e   :  { %v327_v41 = vpop.f32.mrb[0].mxu1 }
 0x13f   :  { %v328_v42 = vadd.f32 %v327_v41, %v257_v39  ;;  %v329_v43 = vpop.f32.mrb[1].mxu1 }
 0x141   :  { %v331_v44 = vadd.f32 %v328_v42, %v190_v13 }
 0x143   :  { %333 = vst.msk [vmem:[#allocation2] sm:$0xff] %vm52_vm6, %v331_v44 }
 0x14a   :  { %v337_v45 = vld [vmem:[#allocation2] sm:$0xff] }
 0x14b   :  { %338 = vst.msk [vmem:[#allocation8] sm:$0xff] %vm52_vm6, %v337_v45 }
 0x14c   :  { %439 = shalt.err (!%p436_p6)
}
 0x14d   :  { %s440_s8 = scalar_lea.hbm %s536_s2, 128 }
 0x14e   :  { %p441_p7 = scmp.ne.s32.totalorder %s536_s2, %s440_s8  ;;  %p444_p8 = scmp.lt.u32.totalorder %s440_s8, %s536_s2 }
 0x150   :  { %p446_p9 = pnand %p444_p8, %p441_p7 }
 0x152   :  { %449 = shalt.err (!%p446_p9)
}
 0x153   :  { %348 = dma.vmem_to_hbm [thread:$0]  %s346_s4, 128, %s536_s2, [#allocation5]  }
 0x154   :  { %454 = dma.done.wait [#allocation5], 128  }
 0x155   :  { %455 = vsyncadd [#allocation5], 4294967168 }
 0x156   :  { %352 = vsyncpa [#allocation4], 1 }
 0x157   :  { %353 = vsyncpa [#allocation7], 1 }
 0x158   :  { %354 = vsyncpa [#allocation5], 1 }

</bundles_post_ra>
